<compile_context>
chip_gen: v6e
topology: v6e:2x2x1
jax: 0.10.0
libtpu: 0.0.40
codegen_flags: <defaults>
</compile_context>

<pallas_src>
import functools

import jax
import jax.numpy as jnp
from jax.experimental import pallas as pl
from jax.experimental.pallas import tpu as pltpu


def moe_kernel(mask_ref, x_ref, wg_ref, wu_ref, wd_ref, comb_ref, o_ref, acc_ref):
    """Grid = (token tile i, expert e, hidden tile h); accumulates over (e, h)."""
    i = pl.program_id(0)
    e = pl.program_id(1)
    h = pl.program_id(2)
    n_e = pl.num_programs(1)
    n_h = pl.num_programs(2)

    @pl.when(jnp.logical_and(e == 0, h == 0))
    def _():
        acc_ref[...] = jnp.zeros_like(acc_ref)

    # Skip experts that no token in this tile routes to.
    # NOTE: weights are still streamed by the BlockSpec DMA; a grouped
    # (sorted-by-expert) formulation would also save that traffic.
    @pl.when(mask_ref[i, e] != 0)
    def _():
        x = x_ref[...]                                                  # (tT, D)   bf16
        g = jnp.dot(x, wg_ref[0], preferred_element_type=jnp.float32)   # (tT, tH)  f32
        u = jnp.dot(x, wu_ref[0], preferred_element_type=jnp.float32)   # (tT, tH)  f32
        hh = (g * jax.nn.sigmoid(g)) * u                                # silu(g)*u, f32
        y = jnp.dot(hh.astype(wd_ref.dtype), wd_ref[0],
                    preferred_element_type=jnp.float32)                 # (tT, D)   f32
        w = comb_ref[0]                                                 # (tT, 1)   f32
        acc_ref[...] += w * y

    @pl.when(jnp.logical_and(e == n_e - 1, h == n_h - 1))
    def _():
        o_ref[...] = acc_ref[...].astype(o_ref.dtype)


def _pick_tile(full, preferred, granule):
    """Largest multiple of `granule` dividing `full`, at most `preferred`."""
    if full <= preferred:
        return full
    t = (preferred // granule) * granule
    while t > granule and full % t != 0:
        t -= granule
    if t <= 0 or full % t != 0:
        return full
    return t


def moe_forward(x, gate_w, wgate, wup, wdown, num_experts_per_tok, *,
                tile_t=None, tile_h=None, compute_dtype=jnp.bfloat16):
    orig_shape = x.shape
    D = x.shape[-1]
    xt = x.reshape(-1, D)
    T = xt.shape[0]
    E, _, H = wgate.shape

    # --- gating glue (tiny): scores -> top-k -> softmax -> combine table ---
    # TODO(synk): top_k has no clean in-kernel Pallas equivalent; kept in plain JAX.
    scores = xt.astype(jnp.float32) @ gate_w.astype(jnp.float32).T       # (T, E)
    top_w, top_i = jax.lax.top_k(scores, num_experts_per_tok)
    top_w = jax.nn.softmax(top_w, axis=-1)
    comb = jnp.sum(
        jax.nn.one_hot(top_i, E, dtype=jnp.float32) * top_w[..., None], axis=1
    )                                                                    # (T, E) f32
    comb_r = comb.T[..., None]                                           # (E, T, 1)

    # --- tiling ---
    if tile_t is None:
        tile_t = _pick_tile(T, 1024, 8)
    if tile_h is None:
        tile_h = _pick_tile(H, 2048, 128)
    assert T % tile_t == 0 and (tile_t == T or tile_t % 8 == 0)
    assert H % tile_h == 0 and (tile_h == H or tile_h % 128 == 0)
    n_tiles = T // tile_t

    # Per-tile routing mask (any token in tile i routed to expert e).
    routed = (comb > 0.0).astype(jnp.int32)                              # (T, E)
    tile_mask = routed.reshape(n_tiles, tile_t, E).max(axis=1).astype(jnp.int32)

    # bf16 compute inputs (fp32 accumulation happens inside the kernel).
    xt_c = xt.astype(compute_dtype)
    wg_c = wgate.astype(compute_dtype)
    wu_c = wup.astype(compute_dtype)
    wd_c = wdown.astype(compute_dtype)

    # Explicit VMEM budget: double-buffered blocks + fp32 accumulator (+ headroom).
    cbytes = jnp.dtype(compute_dtype).itemsize
    block_bytes = (tile_t * D * cbytes                # x tile
                   + 2 * D * tile_h * cbytes          # gate + up weight tiles
                   + tile_h * D * cbytes              # down weight tile
                   + tile_t * 4                       # comb column
                   + tile_t * D * jnp.dtype(xt.dtype).itemsize)  # out tile
    vmem_limit = int(min(64 * 1024 * 1024,
                         max(2 * block_bytes + tile_t * D * 4 + (1 << 20),
                             16 * 1024 * 1024)))

    grid_spec = pltpu.PrefetchScalarGridSpec(
        num_scalar_prefetch=1,
        grid=(n_tiles, E, H // tile_h),
        in_specs=[
            pl.BlockSpec((tile_t, D), lambda i, e, h, m: (i, 0)),
            pl.BlockSpec((1, D, tile_h), lambda i, e, h, m: (e, 0, h)),
            pl.BlockSpec((1, D, tile_h), lambda i, e, h, m: (e, 0, h)),
            pl.BlockSpec((1, tile_h, D), lambda i, e, h, m: (e, h, 0)),
            pl.BlockSpec((1, tile_t, 1), lambda i, e, h, m: (e, i, 0)),
        ],
        out_specs=pl.BlockSpec((tile_t, D), lambda i, e, h, m: (i, 0)),
        scratch_shapes=[pltpu.VMEM((tile_t, D), jnp.float32)],
    )

    out = pl.pallas_call(
        moe_kernel,
        out_shape=jax.ShapeDtypeStruct((T, D), xt.dtype),
        grid_spec=grid_spec,
        compiler_params=pltpu.CompilerParams(
            dimension_semantics=("parallel", "arbitrary", "arbitrary"),
            vmem_limit_bytes=vmem_limit,
        ),
    )(tile_mask, xt_c, wg_c, wu_c, wd_c, comb_r)
    return out.reshape(orig_shape)


def moe_reference(x, gate_w, wgate, wup, wdown, num_experts_per_tok):
    """Pure-JAX fp32 reference mirroring the PyTorch forward."""
    D = x.shape[-1]
    xt = x.reshape(-1, D).astype(jnp.float32)
    E = wgate.shape[0]
    scores = xt @ gate_w.T
    top_w, top_i = jax.lax.top_k(scores, num_experts_per_tok)
    top_w = jax.nn.softmax(top_w, axis=-1)
    all_y = jnp.stack(
        [(jax.nn.silu(xt @ wgate[e]) * (xt @ wup[e])) @ wdown[e] for e in range(E)],
        axis=1,
    )                                                                    # (T, E, D)
    comb = jnp.sum(jax.nn.one_hot(top_i, E, dtype=jnp.float32) * top_w[..., None], axis=1)
    y = jnp.sum(all_y * comb[..., None], axis=1)
    return y.reshape(x.shape)


if __name__ == "__main__":
    # Small shapes consistent with the module.
    batch, seq = 2, 8
    dim = 32          # hidden_size
    multi = 2         # dim_mult
    num_experts = 4
    num_experts_per_tok = 2
    dim_inner = int(dim * multi)

    key = jax.random.PRNGKey(0)
    kx, kg, k1, k2, k3 = jax.random.split(key, 5)

    x = jax.random.normal(kx, (batch, seq, dim), dtype=jnp.float32)
    # gate: nn.Linear(dim, num_experts, bias=False) -> weight (E, D)
    gate_w = jax.random.normal(kg, (num_experts, dim), dtype=jnp.float32) * 0.05
    # experts stacked and pre-transposed to (E, in, out) for x @ W.
    wgate = jax.random.normal(k1, (num_experts, dim, dim_inner), dtype=jnp.float32) * 0.05
    wup = jax.random.normal(k2, (num_experts, dim, dim_inner), dtype=jnp.float32) * 0.05
    wdown = jax.random.normal(k3, (num_experts, dim_inner, dim), dtype=jnp.float32) * 0.05

    run = jax.jit(
        functools.partial(
            moe_forward, num_experts_per_tok=num_experts_per_tok, tile_t=8
        )
    )
    out = run(x, gate_w, wgate, wup, wdown)
    out = jax.block_until_ready(out)

    ref = moe_reference(x, gate_w, wgate, wup, wdown, num_experts_per_tok)
    assert out.shape == x.shape
    # bf16 matmuls inside the kernel vs fp32 reference -> relaxed tolerance.
    assert jnp.allclose(out, ref, atol=1e-2, rtol=1e-2), "mismatch vs reference"

    print("KERNEL_OK")
</pallas_src>

<mosaic_0001>
module attributes {stable_mosaic.version = 11 : i64} {
  func.func @moe_kernel(%arg0: i32, %arg1: i32, %arg2: i32, %arg3: memref<2x4xi32, #tpu.memory_space<smem>>, %arg4: memref<8x32xbf16, #tpu.memory_space<vmem>>, %arg5: memref<1x32x64xbf16, #tpu.memory_space<vmem>>, %arg6: memref<1x32x64xbf16, #tpu.memory_space<vmem>>, %arg7: memref<1x64x32xbf16, #tpu.memory_space<vmem>>, %arg8: memref<1x8x1xf32, #tpu.memory_space<vmem>>, %arg9: memref<8x32xf32, #tpu.memory_space<vmem>>, %arg10: memref<8x32xf32, #tpu.memory_space<vmem>>) attributes {dimension_semantics = [#tpu.dimension_semantics<parallel>, #tpu.dimension_semantics<arbitrary>, #tpu.dimension_semantics<arbitrary>], iteration_bounds = array<i64: 2, 4, 1>, scalar_prefetch = 1 : i64, scratch_operands = 1 : i64, tpu.core_type = #tpu.core_type<tc>, window_params = [{transform_indices = @transform_0, window_bounds = array<i64: 8, 32>}, {transform_indices = @transform_1, window_bounds = array<i64: 1, 32, 64>}, {transform_indices = @transform_2, window_bounds = array<i64: 1, 32, 64>}, {transform_indices = @transform_3, window_bounds = array<i64: 1, 64, 32>}, {transform_indices = @transform_4, window_bounds = array<i64: 1, 8, 1>}, {transform_indices = @transform_5, window_bounds = array<i64: 8, 32>}]} {
    %c0_i32 = arith.constant 0 : i32
    %0 = arith.cmpi eq, %arg1, %c0_i32 : i32
    %c0_i32_0 = arith.constant 0 : i32
    %1 = arith.cmpi eq, %arg2, %c0_i32_0 : i32
    %2 = arith.andi %0, %1 : i1
    %3 = arith.extui %2 : i1 to i32
    %c0_i32_1 = arith.constant 0 : i32
    %4 = arith.cmpi ne, %3, %c0_i32_1 : i32
    scf.if %4 {
      %cst = arith.constant 0.000000e+00 : f32
      %16 = vector.broadcast %cst : f32 to vector<8x32xf32>
      %c0 = arith.constant 0 : index
      %c0_6 = arith.constant 0 : index
      %17 = vector.load %arg10[%c0, %c0_6] : memref<8x32xf32, #tpu.memory_space<vmem>>, vector<8x32xf32>
      tpu.vector_store %arg10[%c0, %c0_6], %16 {strides = array<i32>} : memref<8x32xf32, #tpu.memory_space<vmem>>, vector<8x32xf32>,
    } else {
    }
    %5 = arith.index_cast %arg0 : i32 to index
    %6 = arith.index_cast %arg1 : i32 to index
    %7 = memref.load %arg3[%5, %6] : memref<2x4xi32, #tpu.memory_space<smem>>
    %c0_i32_2 = arith.constant 0 : i32
    %8 = arith.cmpi ne, %7, %c0_i32_2 : i32
    %9 = arith.extui %8 : i1 to i32
    %c0_i32_3 = arith.constant 0 : i32
    %10 = arith.cmpi ne, %9, %c0_i32_3 : i32
    scf.if %10 {
      %c0 = arith.constant 0 : index
      %c0_6 = arith.constant 0 : index
      %16 = vector.load %arg4[%c0, %c0_6] : memref<8x32xbf16, #tpu.memory_space<vmem>>, vector<8x32xbf16>
      %c0_7 = arith.constant 0 : index
      %c0_8 = arith.constant 0 : index
      %c0_9 = arith.constant 0 : index
      %17 = vector.load %arg5[%c0_7, %c0_8, %c0_9] : memref<1x32x64xbf16, #tpu.memory_space<vmem>>, vector<1x32x64xbf16>
      %18 = vector.shape_cast %17 : vector<1x32x64xbf16> to vector<32x64xbf16>
      %cst = arith.constant dense<0.000000e+00> : vector<8x64xf32>
      %19 = tpu.matmul %16, %18, %cst {dimension_numbers = #tpu.dot_dimension_numbers<[1], [0], [0], [1], [0, 0, 1, 1], [], []>} : vector<8x32xbf16>, vector<32x64xbf16>, vector<8x64xf32> -> vector<8x64xf32>
      %c0_10 = arith.constant 0 : index
      %c0_11 = arith.constant 0 : index
      %c0_12 = arith.constant 0 : index
      %20 = vector.load %arg6[%c0_10, %c0_11, %c0_12] : memref<1x32x64xbf16, #tpu.memory_space<vmem>>, vector<1x32x64xbf16>
      %21 = vector.shape_cast %20 : vector<1x32x64xbf16> to vector<32x64xbf16>
      %cst_13 = arith.constant dense<0.000000e+00> : vector<8x64xf32>
      %22 = tpu.matmul %16, %21, %cst_13 {dimension_numbers = #tpu.dot_dimension_numbers<[1], [0], [0], [1], [0, 0, 1, 1], [], []>} : vector<8x32xbf16>, vector<32x64xbf16>, vector<8x64xf32> -> vector<8x64xf32>
      %23 = arith.negf %19 : vector<8x64xf32>
      %24 = math.exp %23 : vector<8x64xf32>
      %cst_14 = arith.constant 1.000000e+00 : f32
      %25 = vector.broadcast %cst_14 : f32 to vector<8x64xf32>
      %26 = arith.addf %25, %24 : vector<8x64xf32>
      %27 = arith.divf %25, %26 : vector<8x64xf32>
      %28 = arith.mulf %19, %27 : vector<8x64xf32>
      %29 = arith.mulf %28, %22 : vector<8x64xf32>
      %30 = arith.truncf %29 : vector<8x64xf32> to vector<8x64xbf16>
      %c0_15 = arith.constant 0 : index
      %c0_16 = arith.constant 0 : index
      %c0_17 = arith.constant 0 : index
      %31 = vector.load %arg7[%c0_15, %c0_16, %c0_17] : memref<1x64x32xbf16, #tpu.memory_space<vmem>>, vector<1x64x32xbf16>
      %32 = vector.shape_cast %31 : vector<1x64x32xbf16> to vector<64x32xbf16>
      %cst_18 = arith.constant dense<0.000000e+00> : vector<8x32xf32>
      %33 = tpu.matmul %30, %32, %cst_18 {dimension_numbers = #tpu.dot_dimension_numbers<[1], [0], [0], [1], [0, 0, 1, 1], [], []>} : vector<8x64xbf16>, vector<64x32xbf16>, vector<8x32xf32> -> vector<8x32xf32>
      %c0_19 = arith.constant 0 : index
      %c0_20 = arith.constant 0 : index
      %c0_21 = arith.constant 0 : index
      %34 = vector.load %arg8[%c0_19, %c0_20, %c0_21] : memref<1x8x1xf32, #tpu.memory_space<vmem>>, vector<1x8x1xf32>
      %35 = vector.shape_cast %34 : vector<1x8x1xf32> to vector<8x1xf32>
      %c0_22 = arith.constant 0 : index
      %c0_23 = arith.constant 0 : index
      %36 = vector.load %arg10[%c0_22, %c0_23] : memref<8x32xf32, #tpu.memory_space<vmem>>, vector<8x32xf32>
      %37 = vector.broadcast %35 : vector<8x1xf32> to vector<8x32xf32>
      %38 = arith.mulf %37, %33 : vector<8x32xf32>
      %39 = arith.addf %36, %38 : vector<8x32xf32>
      %c0_24 = arith.constant 0 : index
      %c0_25 = arith.constant 0 : index
      %40 = vector.load %arg10[%c0_24, %c0_25] : memref<8x32xf32, #tpu.memory_space<vmem>>, vector<8x32xf32>
      tpu.vector_store %arg10[%c0_24, %c0_25], %39 {strides = array<i32>} : memref<8x32xf32, #tpu.memory_space<vmem>>, vector<8x32xf32>,
    } else {
    }
    %c3_i32 = arith.constant 3 : i32
    %11 = arith.cmpi eq, %arg1, %c3_i32 : i32
    %c0_i32_4 = arith.constant 0 : i32
    %12 = arith.cmpi eq, %arg2, %c0_i32_4 : i32
    %13 = arith.andi %11, %12 : i1
    %14 = arith.extui %13 : i1 to i32
    %c0_i32_5 = arith.constant 0 : i32
    %15 = arith.cmpi ne, %14, %c0_i32_5 : i32
    scf.if %15 {
      %c0 = arith.constant 0 : index
      %c0_6 = arith.constant 0 : index
      %16 = vector.load %arg10[%c0, %c0_6] : memref<8x32xf32, #tpu.memory_space<vmem>>, vector<8x32xf32>
      %c0_7 = arith.constant 0 : index
      %c0_8 = arith.constant 0 : index
      %17 = vector.load %arg9[%c0_7, %c0_8] : memref<8x32xf32, #tpu.memory_space<vmem>>, vector<8x32xf32>
      tpu.vector_store %arg9[%c0_7, %c0_8], %16 {strides = array<i32>} : memref<8x32xf32, #tpu.memory_space<vmem>>, vector<8x32xf32>,
    } else {
    }
    return
  }
  func.func @transform_0(%arg0: i32, %arg1: i32, %arg2: i32, %arg3: memref<2x4xi32, #tpu.memory_space<smem>>) -> (i32, i32) {
    %c0_i32 = arith.constant 0 : i32
    %c0_i32_0 = arith.constant 0 : i32
    return %arg0, %c0_i32 : i32, i32
  }
  func.func @transform_1(%arg0: i32, %arg1: i32, %arg2: i32, %arg3: memref<2x4xi32, #tpu.memory_space<smem>>) -> (i32, i32, i32) {
    %c0_i32 = arith.constant 0 : i32
    %c0_i32_0 = arith.constant 0 : i32
    return %arg1, %c0_i32, %arg2 : i32, i32, i32
  }
  func.func @transform_2(%arg0: i32, %arg1: i32, %arg2: i32, %arg3: memref<2x4xi32, #tpu.memory_space<smem>>) -> (i32, i32, i32) {
    %c0_i32 = arith.constant 0 : i32
    %c0_i32_0 = arith.constant 0 : i32
    return %arg1, %c0_i32, %arg2 : i32, i32, i32
  }
  func.func @transform_3(%arg0: i32, %arg1: i32, %arg2: i32, %arg3: memref<2x4xi32, #tpu.memory_space<smem>>) -> (i32, i32, i32) {
    %c0_i32 = arith.constant 0 : i32
    %c0_i32_0 = arith.constant 0 : i32
    return %arg1, %arg2, %c0_i32 : i32, i32, i32
  }
  func.func @transform_4(%arg0: i32, %arg1: i32, %arg2: i32, %arg3: memref<2x4xi32, #tpu.memory_space<smem>>) -> (i32, i32, i32) {
    %c0_i32 = arith.constant 0 : i32
    %c0_i32_0 = arith.constant 0 : i32
    return %arg1, %arg0, %c0_i32 : i32, i32, i32
  }
  func.func @transform_5(%arg0: i32, %arg1: i32, %arg2: i32, %arg3: memref<2x4xi32, #tpu.memory_space<smem>>) -> (i32, i32) {
    %c0_i32 = arith.constant 0 : i32
    %c0_i32_0 = arith.constant 0 : i32
    return %arg0, %c0_i32 : i32, i32
  }
}

</mosaic_0001>

<bundles_post_ra>
// kernel: moe_forward.1
= control target key start
LH: loop header
LB: loop body
LE: loop exit
PB: predicated region body
PF: predicated region fallthrough
CT: control target
= control target key end

     0   :  { %s1265_s0 = inlined_call_operand.vmem [shape: s32[2,4], index: 0, kind: input, shape index: {}]   ;;  %s1266_s1 = inlined_call_operand.vmem [shape: bf16[16,32], index: 1, kind: input, shape index: {}]   ;;  %s1267_s2 = inlined_call_operand.vmem [shape: bf16[4,32,64], index: 2, kind: input, shape index: {}]   ;;  %s1268_s3 = inlined_call_operand.vmem [shape: bf16[4,32,64], index: 3, kind: input, shape index: {}]   ;;  %s1269_s4 = inlined_call_operand.vmem [shape: bf16[4,64,32], index: 4, kind: input, shape index: {}]   ;;  %s1270_s5 = inlined_call_operand.vmem [shape: f32[4,16,1], index: 5, kind: input, shape index: {}]   ;;  %s1271_s6 = inlined_call_operand.hbm [shape: f32[16,32], index: 6, kind: output, shape index: {}]  }
   0x1   :  { %1279 = sst [smem:[#allocation17_spill]] %s1266_s1  ;;  %s11_s23 = sshll.u32 %s1265_s0, 4  ;;  %s12_s23 = int_to_ptr.vmem [resolvable:$true] %s11_s23 }
   0x2   :  { %s943_s24 = scalar_lea.vmem %s12_s23, 32  ;;  %p948_p1 = scmp.lt.s32.totalorder %s12_s23, %s12_s23 }
   0x3   :  { %p944_p0 = scmp.ne.s32.totalorder %s12_s23, %s943_s24  ;;  %p949_p2 = scmp.lt.s32.totalorder %s943_s24, %s943_s24 }
   0x5   :  { %p950_p3 = por %p949_p2, %p948_p1 }
   0x7   :  { %p951_p4 = pnand %p950_p3, %p944_p0 }
   0x9   :  { %954 = shalt.err (!%p951_p4)  }
   0xa   :  { %s1051_s25 = smov [#allocation4]  }
   0xb   :  { %14 = dma.vmem_to_smem %s12_s23, 32, %s1051_s25, [#allocation3] }
   0xc   :  { %1013 = dma.done.wait [#allocation3], 32 }
   0xd   :  { %1014 = vsyncadd [#allocation3], 4294967264 }
   0xe   :  { %16 = sfence }
   0xf   :  { %17 = vsyncpa [#allocation6], 0 }
  0x10   :  { %19 = vsyncpa [#allocation6 + $0x1], 0  ;;  %s1095_s26 = smov 0   ;;  %s1097_s27 = smov 0  }
  0x11   :  { %s1099_s0 = smov 0   ;;  %s1101_s28 = smov 0  }
  0x12   :  { %s1103_s29 = smov 0   ;;  %s1105_s30 = smov 0  }
  0x13   :  { %s1107_s7 = smov 0   ;;  %s1109_s8 = smov 0  }
  0x14 LB: > { %1280 = sst [smem:[#allocation9_spill]] %s1021_s26  ;;  %s775_s9 = sadd.s32 4294967295, %s1049_s8   ;;  %s1049_s8 = sphi %s1109_s8, %s25_s8   ;;  %s1045_s7 = sphi %s1107_s7, %s1299_s7   ;;  %s1041_s30 = sphi %s1105_s30, %s1298_s30   ;;  %s1037_s29 = sphi %s1103_s29, %s1297_s29   ;;  %s1033_s28 = sphi %s1101_s28, %s1296_s28   ;;  %s1029_s0 = sphi %s1099_s0, %s1295_s0   ;;  %s1025_s27 = sphi %s1097_s27, %s1301_s27   ;;  %s1021_s26 = sphi %s1095_s26, %s1300_s26  }
  0x15   : > { %1281 = sst [smem:[#allocation10_spill]] %s1029_s0  ;;  %s776_s10 = sadd.s32 4294967294, %s1049_s8  }
  0x16   : > { %1282 = sst [smem:[#allocation11_spill]] %s1041_s30  ;;  %s40_s11 = sadd.s32 1, %s1041_s30 }
  0x17   : > { %1283 = sst [smem:[#allocation12_spill]] %s1045_s7  ;;  %p42_p5 = scmp.ge.s32.totalorder %s40_s11, 4 }
  0x18   : > { %s44_s12 = sadd.s32 1, %s1045_s7  ;;  %p199_p6 = scmp.ne.s32.totalorder %s1029_s0, %s1025_s27 }
  0x19   : > { %p200_p7 = scmp.eq.s32.totalorder %s775_s9, 7  ;;  %s1303_s11 = smov (%p42_p5, %s40_s11), 0 }
  0x1a   : > { %1284 = sst [smem:[#allocation13_spill]] %s1303_s11  ;;  %s1305_s12 = smov (!%p42_p5, %s44_s12), %s1045_s7 }
  0x1b   : > { %p1144_p8 = por %p200_p7, %p199_p6  ;;  %p205_p9 = scmp.ne.s32.totalorder %s1025_s27, %s1021_s26 }
  0x1c   : > { %p46_p10 = scmp.ge.s32.totalorder %s1305_s12, 2  ;;  %p206_p11 = scmp.eq.s32.totalorder %s776_s10, 7 }
  0x1d   : > { %p779_p12 = scmp.ge.s32.totalorder %s1049_s8, 1  ;;  %p277_p13 = scmp.lt.s32.totalorder %s1049_s8, 9 }
  0x1e   : > { %s1307_s12 = smov (%p46_p10, %s1305_s12), 0  ;;  %p1154_p0 = por %p206_p11, %p205_p9 }
  0x1f   : > { %1286 = sst [smem:[#allocation14_spill]] %s1307_s12  ;;  %p278_p1 = pnand %p779_p12, %p277_p13 }
  0x20   : > { %s1287_s14 = scalar_select %p1154_p0, 1, 0 }
  0x21   : > { %s186_s15 = ssub.s32 %s1045_s7, %s1307_s12  ;;  %s189_s16 = sadd.s32 1, %s1029_s0 }
  0x22   : > { %1288 = sst [smem:[#allocation15_spill]] %s1287_s14  ;;  %p187_p2 = scmp.eq.s32.totalorder %s186_s15, 0 }
  0x23   : > { %281 = sbr.rel (%p278_p1) target bundleno = 539 (0x21b), region = 40  ;;  %s1273_s18 = sand.u32 (!%p278_p1), 1, %s1025_s27  }
  0x24   : > { %s1162_s17 = scalar_select %p187_p2, %s1029_s0, %s189_s16  }
  0x25   : > { %p337_p3 = scmp.lt.s32.totalorder (!%p278_p1), %s1037_s29, 1  ;;  %s1168_s19 = sshll.u32 (!%p278_p1), %s1273_s18, 3 }
  0x26   : > { %1289 = sst [smem:[#allocation16_spill]] %s1162_s17  ;;  %p341_p4 = scmp.lt.s32.totalorder (!%p278_p1), %s1033_s28, 3 }
  0x27   : > { %p376_p5 = scmp.eq.s32.totalorder (!%p278_p1), %s1033_s28, 0  ;;  %s1290_s1 = sld [smem:[#allocation17_spill]] (!%p278_p1) }
  0x28   : > { %s338_s20 = scalar_select %p337_p3, %s1037_s29, 1  ;;  %vm382_vm0 = vcmask (%p376_p5), 261120   ;;  %v1052_v0 = vmov (%p376_p5), 0.0  }
  0x29   : > { %s342_s21 = scalar_select %p341_p4, %s1033_s28, 3  ;;  %383 = vst.msk [vmem:[#allocation2] sm:$0xff] (%p376_p5), %vm382_vm0, %v1052_v0 }
  0x2a   : > { %s781_s22 = sshll.u32 %s338_s20, 2  ;;  %s336_s10 = scalar_lea.vmem [#allocation5], %s1168_s19 }
  0x2b   : > { %s810_s9 = sshll.u32 %s342_s21, 4  ;;  %s812_s7 = sshll.u32 %s342_s21, 5 }
  0x2c   : > { %s348_s16 = scalar_lea.vmem %s1267_s2, %s810_s9  ;;  %s1185_s18 = scalar_lea.vmem %s1268_s3, %s810_s9 }
  0x2d   : > { %s1177_s25 = scalar_lea.vmem %s1290_s1, %s781_s22  ;;  %s788_s30 = sshll.u32 %s342_s21, 1 }
  0x2e   : > { %s1190_s14 = scalar_lea.vmem %s1269_s4, %s812_s7  ;;  %s372_s23 = sadd.s32 %s788_s30, %s338_s20 }
  0x2f   : > { %s789_s22 = sshll.u32 %s372_s23, 3  ;;  %381 = sbr.rel (!%p376_p5) target bundleno = 52 (0x34), region = 44 }
  0x30   : > { %s1195_s26 = scalar_lea.vmem %s1270_s5, %s789_s22 }
  0x34 PF: > { %s384_s0 = sshra.s32 %s1033_s28, 7  ;;  %s389_s7 = sand.u32 127, %s1033_s28 }
  0x35   : > { %s386_s30 = sadd.s32 %s1037_s29, %s384_s0 }
  0x36   : > { %s791_s11 = sshll.u32 %s386_s30, 7 }
  0x37   : > { %s390_s12 = sadd.s32 %s791_s11, %s389_s7 }
  0x38   : > { %s391_s17 = sld [smem:[#allocation4 + %s390_s12]] }
  0x3e   : > { %p792_p6 = scmp.eq.s32.totalorder %s391_s17, 0 }
  0x40   : > { %395 = sbr.rel (%p792_p6) target bundleno = 508 (0x1fc), region = 48 }
  0x45   : > { %v931_v1 = vld [vmem:[%s348_s16 + $0x8] sm:$0xff]   ;;  %v1053_v2 = vmov 0.0   ;;  %v932_v3 = vld [vmem:[%s348_s16] sm:$0xff]   ;;  %vm1054_vm1 = vmmov 0   ;;  %vm413_vm2 = vcmask 261120   ;;  %v935_v7 = vld [vmem:[%s1190_s14 + $0x18] sm:$0xff]  }
  0x46   : > { %826 = vmatprep.subr.bf16.mxu1 %v1053_v2  ;;  %842 = vmatprep.subr.bf16.mxu0 %v1053_v2  ;;  %v396_v4 = vld [vmem:[%s1177_s25] sm:$0xf]  ;;  %v933_v5 = vld [vmem:[%s1185_s18 + $0x8] sm:$0xff]   ;;  %v936_v8 = vld [vmem:[%s1190_s14 + $0x10] sm:$0xff]   ;;  %v1055_v12 = vmov 0   ;;  %vm554_vm3 = vcmask 523264  }
  0x47   : > { %827 = vmatpush3.bf16.msra.mxu1 %v931_v1  ;;  %830 = vmatprep.mubr.msk.bf16.mxu1 %vm1054_vm1, %v1053_v2  ;;  %v934_v6 = vld [vmem:[%s1185_s18] sm:$0xff]   ;;  %v937_v9 = vld [vmem:[%s1190_s14 + $0x8] sm:$0xff]  }
  0x48   : > { %828 = vmatprep.subr.bf16.mxu1 %v1053_v2  ;;  %850 = vmatprep.mubr.msk.bf16.mxu0 %vm1054_vm1, %v1053_v2  ;;  %v938_v10 = vld [vmem:[%s1190_s14] sm:$0xff]  }
  0x49   : > { %843 = vmatpush3.bf16.msra.mxu0 %v935_v7  ;;  %v598_v11 = vld [vmem:[%s1195_s26] sm:$0xff]  ;;  %930 = vset.pattern.permute.xlu0 %v1055_v12 }
  0x4a   : > { %844 = vmatprep.subr.bf16.mxu0 %v1053_v2  ;;  %602 = vperm.xlu0 %930, %v598_v11   ;;  %v599_v30 = vld [vmem:[#allocation2] sm:$0xff] }
  0x4b   : > { %829 = vmatpush3.bf16.msra.mxu1 %v932_v3 }
  0x4c   : > { %834 = vmatprep.subr.bf16.mxu1 %v1053_v2 }
  0x4d   : > { %845 = vmatpush3.bf16.msra.mxu0 %v936_v8 }
  0x4e   : > { %831 = vmatmul.mubr.msk.bf16.vlgmr.msra.gmra.mxu1 %vm413_vm2, %v396_v4  ;;  %846 = vmatprep.subr.bf16.mxu0 %v1053_v2 }
  0x4f   : > { %835 = vmatpush3.bf16.msra.mxu1 %v933_v5  ;;  %838 = vmatprep.mubr.msk.bf16.mxu1 %vm1054_vm1, %v1053_v2 }
  0x50   : > { %836 = vmatprep.subr.bf16.mxu1 %v1053_v2 }
  0x51   : > { %847 = vmatpush3.bf16.msra.mxu0 %v937_v9 }
  0x52   : > { %848 = vmatprep.subr.bf16.mxu0 %v1053_v2 }
  0x53   : > { %837 = vmatpush3.bf16.msra.mxu1 %v934_v6 }
  0x55   : > { %849 = vmatpush3.bf16.msra.mxu0 %v938_v10 }
  0x56   : > { %839 = vmatmul.mubr.msk.bf16.vlgmr.msra.gmra.mxu1 %vm413_vm2, %v396_v4 }
  0xc5   : > { %v603_v28 = vpop.permute.xlu0 %602 }
 0x10e   : > { %v451_v13 = vpop.f32.mrf.mxu1 }
 0x10f   : > { %v799_v14 = vmul.f32 -1.442695, %v451_v13 }
 0x110   : > { %v832_v15 = vpop.f32.mrf.mxu1 }
 0x111   : > { %939 = vpow2.f32 %v799_v14 }
 0x112   : > { %v454_v16 = vpop.f32.mrf.mxu1 }
 0x114   : > { %v833_v17 = vpop.f32.mrf.mxu1 }
 0x116   : > { %v507_v18 = vpop.f32.mrf.mxu1 }
 0x118   : > { %v840_v19 = vpop.f32.mrf.mxu1 }
 0x11a   : > { %v510_v20 = vpop.f32.mrf.mxu1 }
 0x11c   : > { %v841_v21 = vpop.f32.mrf.mxu1 }
 0x11e   : > { %v940_v22 = vpop.eup %939 }
 0x11f   : > { %v516_v23 = vadd.f32 1.0, %v940_v22 }
 0x121   : > { %941 = vrcp.f32 %v516_v23 }
 0x12e   : > { %v942_v24 = vpop.eup %941 }
 0x12f   : > { %v519_v25 = vmul.f32 %v942_v24, %v451_v13 }
 0x131   : > { %v520_v26 = vmul.f32 %v519_v25, %v507_v18 }
 0x133   : > { %v521_v27 = vpack.c.bf16 %v520_v26, %v520_v26 }
 0x135   : > { %851 = vmatmul.mubr.msk.bf16.vlgmr.msra.gmra.mxu0 %vm554_vm3, %v521_v27 }
 0x1f5   : > { %v592_v29 = vpop.f32.mrf.mxu0 }
 0x1f6   : > { %v605_v31 = vmul.f32 %v603_v28, %v592_v29 }
 0x1f7   : > { %v852_v32 = vpop.f32.mrf.mxu0 }
 0x1f8   : > { %v606_v33 = vadd.f32 %v605_v31, %v599_v30 }
 0x1f9   : > { %v595_v34 = vpop.f32.mrf.mxu0 }
 0x1fa   : > { %607 = vst.msk [vmem:[#allocation2] sm:$0xff] %vm413_vm2, %v606_v33 }
 0x1fb   : > { %v853_v35 = vpop.f32.mrf.mxu0 }
 0x1fc PF: > { %p608_p7 = scmp.eq.s32.totalorder %s1033_s28, 3 }
 0x1fd   : > { %vm614_vm4 = vcmask (%p608_p7), 261120  }
 0x1fe   : > { %612 = sbr.rel (!%p608_p7) target bundleno = 515 (0x203), region = 52 }
 0x201   : > { %v613_v36 = vld [vmem:[#allocation2] sm:$0xff] (%p608_p7) }
 0x202   : > { %615 = vst.msk [vmem:[%s336_s10] sm:$0xff] (%p608_p7), %vm614_vm4, %v613_v36 }
 0x203 PF: > { %s807_s1 = sshll.u32 %s1037_s29, 7  ;;  %s630_s20 = sshll.u32 %s336_s10, 4  ;;  %s631_s20 = int_to_ptr.vmem [resolvable:$true] %s630_s20 }
 0x204   : > { %s628_s18 = scalar_lea.hbm %s1271_s6, %s807_s1  ;;  %s1291_s28 = sand.u32 1, %s1025_s27  }
 0x205   : > { %s617_s21 = scalar_lea.sflag [#allocation6], %s1291_s28  ;;  %s955_s25 = scalar_lea.vmem %s631_s20, 128 }
 0x206   : > { %p956_p9 = scmp.ne.s32.totalorder %s631_s20, %s955_s25  ;;  %s1056_s9 = smov [#allocation5]  }
 0x207   : > { %s959_s15 = sshll.u32 %s1056_s9, 4  ;;  %s960_s15 = int_to_ptr.vmem [resolvable:$false] %s959_s15 }
 0x208   : > { %p957_p10 = pnand %p956_p9, %p1144_p8  ;;  %s961_s16 = scalar_lea.vmem %s960_s15, 256 }
 0x209   : > { %p962_p12 = scmp.lt.s32.totalorder %s631_s20, %s960_s15  ;;  %p963_p13 = scmp.lt.s32.totalorder %s961_s16, %s955_s25 }
 0x20a   : > { %p958_p11 = pneg %p957_p10 }
 0x20b   : > { %p964_p1 = por %p963_p13, %p962_p12 }
 0x20d   : > { %p965_p2 = pnand %p964_p1, %p958_p11 }
 0x20f   : > { %968 = shalt.err (!%p965_p2)
}
 0x210   : > { %s969_s29 = scalar_lea.hbm %s628_s18, 128  ;;  %s973_s22 = scalar_lea.hbm %s1271_s6, 256 }
 0x211   : > { %p970_p3 = scmp.ne.s32.totalorder %s628_s18, %s969_s29  ;;  %p974_p6 = scmp.lt.s32.totalorder %s628_s18, %s1271_s6 }
 0x212   : > { %p975_p7 = scmp.lt.s32.totalorder %s973_s22, %s969_s29 }
 0x213   : > { %p971_p4 = pnand %p970_p3, %p1144_p8 }
 0x214   : > { %p976_p9 = por %p975_p7, %p974_p6 }
 0x215   : > { %p972_p5 = pneg %p971_p4 }
 0x217   : > { %p977_p10 = pnand %p976_p9, %p972_p5 }
 0x219   : > { %980 = shalt.err (!%p977_p10)
}
 0x21a   : > { %854 = dma.vmem_to_hbm [thread:$0]  (%p1144_p8), %s631_s20, 128, %s628_s18, %s617_s21  }
 0x21b PF: > { %s1292_s0 = sld [smem:[#allocation9_spill]]  ;;  %p860_p11 = scmp.ge.s32.totalorder %s1049_s8, 2 }
 0x21d   : > { %p857_p12 = pnand %p860_p11, %p1154_p0 }
 0x21f   : > { %p858_p13 = pneg %p857_p12 }
 0x221   : > { %s642_s30 = sand.u32 1, %s1292_s0  }
 0x222   : > { %s643_s11 = scalar_lea.sflag [#allocation6], %s642_s30 }
 0x223   : > { %1016 = dma.done.wait (%p858_p13), %s643_s11, 128  }
 0x224   : > { %1018 = vsyncadd (%p858_p13), %s643_s11, 4294967168  ;;  %s25_s8 = sadd.s32 1, %s1049_s8   ;;  %s1294_s12 = sld [smem:[#allocation10_spill]] }
 0x225   : > { %p22_p1 = scmp.ge.s32.totalorder %s25_s8, 10   ;;  %s1295_s0 = sld [smem:[#allocation16_spill]] }
 0x226   : > { %s1296_s28 = sld [smem:[#allocation11_spill]]  ;;  %s1300_s26 = smov %s1025_s27 }
 0x227   : > { %s1297_s29 = sld [smem:[#allocation12_spill]]  ;;  %24 = sbr.rel (!%p22_p1) target bundleno = 20 (0x14), region = 99 }
 0x228   : > { %s1298_s30 = sld [smem:[#allocation13_spill]] }
 0x229   : > { %s1299_s7 = sld [smem:[#allocation14_spill]] }
 0x22a   : > { %s1301_s27 = smov %s1294_s12 }
 0x22c   :  { %648 = vsyncpa [#allocation6], 1 }
 0x22d   :  { %650 = vsyncpa [#allocation6 + $0x1], 1 }

</bundles_post_ra>
